<compile_context>
chip_gen: v7x
topology: tpu7x:2x2x1
jax: 0.10.0
libtpu: 0.0.40
codegen_flags: <defaults>
</compile_context>

<pallas_src>
import functools

import jax
import jax.numpy as jnp
from jax.experimental import pallas as pl
from jax.experimental.pallas import tpu as pltpu


def _round_up(x, m):
    return ((x + m - 1) // m) * m


def _quantile_loss_kernel(preds_ref, target_ref, o_ref, acc_ref, *, quantiles):
    # preds_ref:  (Q, R, L)  VMEM tile (Q dense (R, L) slabs)
    # target_ref: (1, R, L)  VMEM tile
    # o_ref:      (1, 1)     SMEM partial-sum output (one per outer grid index)
    # acc_ref:    (R, L)     persistent f32 running per-lane partial sum
    step = pl.program_id(1)

    @pl.when(step == 0)
    def _init():
        acc_ref[...] = jnp.zeros_like(acc_ref)

    # Whole-tile loads; dtype convert happens once per element.
    preds = preds_ref[...].astype(jnp.float32)    # (Q, R, L)
    target = target_ref[0].astype(jnp.float32)    # (R, L)

    # Unrolled over the small static quantile list; every operand is a fully
    # dense (R, L) slab and q / (q - 1) are scalar compile-time constants.
    partial = None
    for i, q in enumerate(quantiles):
        q = float(q)
        e = target - preds[i]                               # (R, L)
        term = jnp.maximum((q - 1.0) * e, q * e)            # pinball loss
        partial = term if partial is None else partial + term

    acc_ref[...] += partial                                  # VPU-only steady state

    @pl.when(step == pl.num_programs(1) - 1)
    def _finalize():
        # Single cross-lane/sublane reduce + scalar store, once per partial.
        o_ref[0, 0] = jnp.sum(acc_ref[...])


def quantile_loss(preds, target, quantiles, *,
                  lane_block=512, row_block=256, num_partials=2):
    """preds: (B, Q), target: (B,), quantiles: list of Q Python floats."""
    B, Q = preds.shape
    assert len(quantiles) == Q
    quantiles = [float(q) for q in quantiles]

    # Lane-major layout: quantile on the leading axis, batch flattened onto
    # dense (rows, lane_block) slabs.
    p = preds.T                      # (Q, B)
    t = target.reshape(1, B)         # (1, B)

    # Normalize user tile knobs to hardware-legal multiples.
    lane_block = max(128, _round_up(lane_block, 128))
    row_block = max(8, _round_up(row_block, 8))

    # Adapt tiling to small batches so padding stays bounded.
    lb = min(lane_block, _round_up(B, 128))
    rows = pl.cdiv(B, lb)
    rb = min(row_block, _round_up(rows, 8))
    nblocks = pl.cdiv(rows, rb)
    nparts = max(1, min(num_partials, nblocks))
    steps = pl.cdiv(nblocks, nparts)

    padded_rows = nparts * steps * rb
    padded_b = padded_rows * lb
    pad = padded_b - B
    if pad:
        # Zero-pad both preds and target: error == 0 -> loss == 0, so padded
        # lanes contribute nothing to the running sum.
        p = jnp.pad(p, ((0, 0), (0, pad)))
        t = jnp.pad(t, ((0, 0), (0, pad)))

    # Contiguous (copy-free) reshapes to the sublane/lane dense 3-D view.
    p = p.reshape(Q, padded_rows, lb)
    t = t.reshape(1, padded_rows, lb)

    kernel = functools.partial(_quantile_loss_kernel, quantiles=quantiles)

    itemsize = preds.dtype.itemsize
    # Double-buffered inputs + f32 accumulator, plus headroom; capped so it is
    # legal on every generation (v7x has 64 MiB per TensorCore).
    block_bytes = 2 * (Q + 1) * rb * lb * itemsize + rb * lb * 4
    vmem_limit = int(min(max(2 * block_bytes, 16 * 1024 * 1024), 48 * 1024 * 1024))

    partials = pl.pallas_call(
        kernel,
        out_shape=jax.ShapeDtypeStruct((nparts, 1), jnp.float32),
        grid_spec=pltpu.PrefetchScalarGridSpec(
            num_scalar_prefetch=0,
            grid=(nparts, steps),
            in_specs=[
                pl.BlockSpec((Q, rb, lb), lambda c, s: (0, c * steps + s, 0)),
                pl.BlockSpec((1, rb, lb), lambda c, s: (0, c * steps + s, 0)),
            ],
            out_specs=pl.BlockSpec(
                (1, 1), lambda c, s: (c, 0), memory_space=pltpu.SMEM
            ),
            scratch_shapes=[pltpu.VMEM((rb, lb), jnp.float32)],
        ),
        compiler_params=pltpu.CompilerParams(
            # Outer axis: independent per-core partials (megacore on v7x).
            # Inner axis: reduction with a resident accumulator -> arbitrary.
            dimension_semantics=("parallel", "arbitrary"),
            vmem_limit_bytes=vmem_limit,
        ),
        cost_estimate=pl.CostEstimate(
            flops=5 * B * Q,
            transcendentals=0,
            bytes_accessed=(Q + 1) * B * itemsize,
        ),
    )(p, t)

    # mean over batch of the per-row sum over quantiles == total_sum / B,
    # with 1/B folded in as a trace-time constant.
    return jnp.sum(partials) * (1.0 / B)


def quantile_loss_ref(preds, target, quantiles):
    """Pure-JAX reference mirroring the PyTorch forward."""
    losses = []
    for i, q in enumerate(quantiles):
        errors = target - preds[:, i]
        losses.append(jnp.maximum((q - 1.0) * errors, q * errors)[:, None])
    return jnp.mean(jnp.sum(jnp.concatenate(losses, axis=1), axis=1))


if __name__ == "__main__":
    quantiles = [0.1, 0.5, 0.9]
    B, Q = 8, len(quantiles)

    key = jax.random.PRNGKey(0)
    kp, kt = jax.random.split(key)
    preds = jax.random.normal(kp, (B, Q), dtype=jnp.float32)
    target = jax.random.normal(kt, (B,), dtype=jnp.float32)

    loss = quantile_loss(preds, target, quantiles)
    jax.block_until_ready(loss)

    ref = quantile_loss_ref(preds, target, quantiles)
    assert jnp.allclose(loss, ref, rtol=1e-5, atol=1e-6), (loss, ref)

    print("KERNEL_OK")
</pallas_src>

<mosaic_0001>
module attributes {stable_mosaic.version = 11 : i64} {
  func.func @_quantile_loss_kernel(%arg0: i32, %arg1: i32, %arg2: memref<3x8x128xf32, #tpu.memory_space<vmem>>, %arg3: memref<1x8x128xf32, #tpu.memory_space<vmem>>, %arg4: memref<1x1xf32, #tpu.memory_space<smem>>, %arg5: memref<8x128xf32, #tpu.memory_space<vmem>>) attributes {dimension_semantics = [#tpu.dimension_semantics<parallel>, #tpu.dimension_semantics<arbitrary>], iteration_bounds = array<i64: 1, 1>, scalar_prefetch = 0 : i64, scratch_operands = 1 : i64, tpu.core_type = #tpu.core_type<tc>, window_params = [{transform_indices = @transform_0, window_bounds = array<i64: 3, 8, 128>}, {transform_indices = @transform_1, window_bounds = array<i64: 1, 8, 128>}, {transform_indices = @transform_2, window_bounds = array<i64: 1, 1>}]} {
    %c0_i32 = arith.constant 0 : i32
    %0 = arith.cmpi eq, %arg1, %c0_i32 : i32
    %1 = arith.extui %0 : i1 to i32
    %c0_i32_0 = arith.constant 0 : i32
    %2 = arith.cmpi ne, %1, %c0_i32_0 : i32
    scf.if %2 {
      %cst_17 = arith.constant 0.000000e+00 : f32
      %38 = vector.broadcast %cst_17 : f32 to vector<8x128xf32>
      %c0_18 = arith.constant 0 : index
      %c0_19 = arith.constant 0 : index
      %39 = vector.load %arg5[%c0_18, %c0_19] : memref<8x128xf32, #tpu.memory_space<vmem>>, vector<8x128xf32>
      tpu.vector_store %arg5[%c0_18, %c0_19], %38 {strides = array<i32>} : memref<8x128xf32, #tpu.memory_space<vmem>>, vector<8x128xf32>,
    } else {
    }
    %c0 = arith.constant 0 : index
    %c0_1 = arith.constant 0 : index
    %c0_2 = arith.constant 0 : index
    %3 = vector.load %arg2[%c0, %c0_1, %c0_2] : memref<3x8x128xf32, #tpu.memory_space<vmem>>, vector<3x8x128xf32>
    %c0_3 = arith.constant 0 : index
    %c0_4 = arith.constant 0 : index
    %c0_5 = arith.constant 0 : index
    %4 = vector.load %arg3[%c0_3, %c0_4, %c0_5] : memref<1x8x128xf32, #tpu.memory_space<vmem>>, vector<1x8x128xf32>
    %5 = vector.shape_cast %4 : vector<1x8x128xf32> to vector<8x128xf32>
    %6 = vector.extract_strided_slice %3 {offsets = [0, 0, 0], sizes = [1, 8, 128], strides = [1, 1, 1]} : vector<3x8x128xf32> to vector<1x8x128xf32>
    %7 = vector.shape_cast %6 : vector<1x8x128xf32> to vector<8x128xf32>
    %8 = arith.subf %5, %7 : vector<8x128xf32>
    %cst = arith.constant -0.899999976 : f32
    %9 = vector.broadcast %cst : f32 to vector<8x128xf32>
    %10 = arith.mulf %9, %8 : vector<8x128xf32>
    %cst_6 = arith.constant 1.000000e-01 : f32
    %11 = vector.broadcast %cst_6 : f32 to vector<8x128xf32>
    %12 = arith.mulf %11, %8 : vector<8x128xf32>
    %13 = arith.maximumf %10, %12 : vector<8x128xf32>
    %14 = vector.extract_strided_slice %3 {offsets = [1, 0, 0], sizes = [1, 8, 128], strides = [1, 1, 1]} : vector<3x8x128xf32> to vector<1x8x128xf32>
    %15 = vector.shape_cast %14 : vector<1x8x128xf32> to vector<8x128xf32>
    %16 = arith.subf %5, %15 : vector<8x128xf32>
    %cst_7 = arith.constant -5.000000e-01 : f32
    %17 = vector.broadcast %cst_7 : f32 to vector<8x128xf32>
    %18 = arith.mulf %17, %16 : vector<8x128xf32>
    %cst_8 = arith.constant 5.000000e-01 : f32
    %19 = vector.broadcast %cst_8 : f32 to vector<8x128xf32>
    %20 = arith.mulf %19, %16 : vector<8x128xf32>
    %21 = arith.maximumf %18, %20 : vector<8x128xf32>
    %22 = arith.addf %13, %21 : vector<8x128xf32>
    %23 = vector.extract_strided_slice %3 {offsets = [2, 0, 0], sizes = [1, 8, 128], strides = [1, 1, 1]} : vector<3x8x128xf32> to vector<1x8x128xf32>
    %24 = vector.shape_cast %23 : vector<1x8x128xf32> to vector<8x128xf32>
    %25 = arith.subf %5, %24 : vector<8x128xf32>
    %cst_9 = arith.constant -1.000000e-01 : f32
    %26 = vector.broadcast %cst_9 : f32 to vector<8x128xf32>
    %27 = arith.mulf %26, %25 : vector<8x128xf32>
    %cst_10 = arith.constant 0.899999976 : f32
    %28 = vector.broadcast %cst_10 : f32 to vector<8x128xf32>
    %29 = arith.mulf %28, %25 : vector<8x128xf32>
    %30 = arith.maximumf %27, %29 : vector<8x128xf32>
    %31 = arith.addf %22, %30 : vector<8x128xf32>
    %c0_11 = arith.constant 0 : index
    %c0_12 = arith.constant 0 : index
    %32 = vector.load %arg5[%c0_11, %c0_12] : memref<8x128xf32, #tpu.memory_space<vmem>>, vector<8x128xf32>
    %33 = arith.addf %32, %31 : vector<8x128xf32>
    %c0_13 = arith.constant 0 : index
    %c0_14 = arith.constant 0 : index
    %34 = vector.load %arg5[%c0_13, %c0_14] : memref<8x128xf32, #tpu.memory_space<vmem>>, vector<8x128xf32>
    tpu.vector_store %arg5[%c0_13, %c0_14], %33 {strides = array<i32>} : memref<8x128xf32, #tpu.memory_space<vmem>>, vector<8x128xf32>,
    %c0_i32_15 = arith.constant 0 : i32
    %35 = arith.cmpi eq, %arg1, %c0_i32_15 : i32
    %36 = arith.extui %35 : i1 to i32
    %c0_i32_16 = arith.constant 0 : i32
    %37 = arith.cmpi ne, %36, %c0_i32_16 : i32
    scf.if %37 {
      %c0_17 = arith.constant 0 : index
      %c0_18 = arith.constant 0 : index
      %38 = vector.load %arg5[%c0_17, %c0_18] : memref<8x128xf32, #tpu.memory_space<vmem>>, vector<8x128xf32>
      %39 = vector.shape_cast %38 : vector<8x128xf32> to vector<1x8x128xf32>
      %cst_19 = arith.constant dense<0.000000e+00> : vector<1xf32>
      %40 = vector.multi_reduction <add>, %39, %cst_19 [1, 2] : vector<1x8x128xf32> to vector<1xf32>
      %41 = vector.shape_cast %40 : vector<1xf32> to vector<1x1x1xf32>
      %42 = vector.extract %41[0, 0, 0] : f32 from vector<1x1x1xf32>
      %c0_20 = arith.constant 0 : index
      %c0_21 = arith.constant 0 : index
      %43 = memref.load %arg4[%c0_20, %c0_21] : memref<1x1xf32, #tpu.memory_space<smem>>
      memref.store %42, %arg4[%c0_20, %c0_21] : memref<1x1xf32, #tpu.memory_space<smem>>
    } else {
    }
    return
  }
  func.func @transform_0(%arg0: i32, %arg1: i32) -> (i32, i32, i32) {
    %c1_i32 = arith.constant 1 : i32
    %0 = arith.muli %arg0, %c1_i32 : i32
    %1 = arith.addi %0, %arg1 : i32
    %c0_i32 = arith.constant 0 : i32
    %c0_i32_0 = arith.constant 0 : i32
    %c0_i32_1 = arith.constant 0 : i32
    return %c0_i32, %1, %c0_i32_0 : i32, i32, i32
  }
  func.func @transform_1(%arg0: i32, %arg1: i32) -> (i32, i32, i32) {
    %c1_i32 = arith.constant 1 : i32
    %0 = arith.muli %arg0, %c1_i32 : i32
    %1 = arith.addi %0, %arg1 : i32
    %c0_i32 = arith.constant 0 : i32
    %c0_i32_0 = arith.constant 0 : i32
    %c0_i32_1 = arith.constant 0 : i32
    return %c0_i32, %1, %c0_i32_0 : i32, i32, i32
  }
  func.func @transform_2(%arg0: i32, %arg1: i32) -> (i32, i32) {
    %c0_i32 = arith.constant 0 : i32
    %c0_i32_0 = arith.constant 0 : i32
    return %arg0, %c0_i32 : i32, i32
  }
}

</mosaic_0001>

<bundles_post_ra>
// kernel: tpu_custom_call.1
= control target key start
LH: loop header
LB: loop body
LE: loop exit
PB: predicated region body
PF: predicated region fallthrough
CT: control target
= control target key end

     0   :  { %7 = vsyncpa [#allocation4], 0  ;;  %s225_s0 = inlined_call_operand.hbm [shape: f32[3,8,128], index: 0, kind: input, shape index: {}]   ;;  %s226_s1 = inlined_call_operand.hbm [shape: f32[1,8,128], index: 1, kind: input, shape index: {}]   ;;  %s227_s2 = inlined_call_operand.hbm [shape: f32[1,1], index: 2, kind: output, shape index: {}]  }
   0x1   :  { %8 = vsyncpa [#allocation7], 0 }
   0x2   :  { %9 = vsyncpa [#allocation5], 0  ;;  %s169_s9 = smov [#allocation3]   ;;  %s109_s13 = scalar_lea.hbm %s225_s0, 384 }
   0x3   :  { %s18_s10 = sshll.u32 %s169_s9, 4  ;;  %p110_p0 = scmp.ne.s32.totalorder %s225_s0, %s109_s13  ;;  %s19_s10 = int_to_ptr.vmem [resolvable:$true] %s18_s10 }
   0x4   :  { %p113_p1 = scmp.lt.u32.totalorder %s109_s13, %s225_s0 }
   0x6   :  { %p115_p2 = pnand %p113_p1, %p110_p0 }
   0x8   :  { %118 = shalt.err (!%p115_p2)
}
   0x9   :  { %s119_s18 = scalar_lea.vmem %s19_s10, 384  ;;  %p124_p4 = scmp.lt.s32.totalorder %s19_s10, %s19_s10 }
   0xa   :  { %p120_p3 = scmp.ne.s32.totalorder %s19_s10, %s119_s18  ;;  %p125_p5 = scmp.lt.s32.totalorder %s119_s18, %s119_s18 }
   0xc   :  { %p126_p6 = por %p125_p5, %p124_p4 }
   0xe   :  { %p127_p7 = pnand %p126_p6, %p120_p3 }
  0x10   :  { %130 = shalt.err (!%p127_p7)
}
  0x11   :  { %s170_s19 = smov 128   ;;  %s171_s20 = smov 8  }
  0x12   :  { %24 = dma.hbm_to_vmem [thread:$0]  %s225_s0, 384, %s19_s10, [#allocation4], %s170_s19, %s170_s19, %s171_s20  }
  0x13   :  { %s172_s23 = smov [#allocation6]   ;;  %s131_s27 = scalar_lea.hbm %s226_s1, 128 }
  0x14   :  { %s34_s24 = sshll.u32 %s172_s23, 4  ;;  %p132_p8 = scmp.ne.s32.totalorder %s226_s1, %s131_s27  ;;  %s35_s24 = int_to_ptr.vmem [resolvable:$true] %s34_s24 }
  0x15   :  { %p135_p9 = scmp.lt.u32.totalorder %s131_s27, %s226_s1 }
  0x17   :  { %p137_p10 = pnand %p135_p9, %p132_p8 }
  0x19   :  { %140 = shalt.err (!%p137_p10)
}
  0x1a   :  { %s141_s4 = scalar_lea.vmem %s35_s24, 128  ;;  %p146_p12 = scmp.lt.s32.totalorder %s35_s24, %s35_s24 }
  0x1b   :  { %p142_p11 = scmp.ne.s32.totalorder %s35_s24, %s141_s4  ;;  %p147_p13 = scmp.lt.s32.totalorder %s141_s4, %s141_s4 }
  0x1d   :  { %p148_p0 = por %p147_p13, %p146_p12 }
  0x1f   :  { %p149_p1 = pnand %p148_p0, %p142_p11 }
  0x21   :  { %152 = shalt.err (!%p149_p1)
}
  0x22   :  { %37 = dma.hbm_to_vmem [thread:$0]  %s226_s1, 128, %s35_s24, [#allocation7]  }
  0x23   :  { %163 = dma.done.wait [#allocation4], 384  }
  0x24   :  { %164 = vsyncadd [#allocation4], 4294966912 }
  0x25   :  { %165 = dma.done.wait [#allocation7], 128  }
  0x26   :  { %166 = vsyncadd [#allocation7], 4294967168  ;;  %v51_v0 = vld [vmem:[#allocation3] sm:$0xff]  ;;  %v52_v1 = vld [vmem:[#allocation3 + $0x8] sm:$0xff]  ;;  %s153_s8 = scalar_lea.hbm %s227_s2, 16 }
  0x27   :  { %v53_v2 = vld [vmem:[#allocation3 + $0x10] sm:$0xff]  ;;  %v54_v3 = vld [vmem:[#allocation6] sm:$0xff]  ;;  %p154_p2 = scmp.ne.s32.totalorder %s227_s2, %s153_s8  ;;  %p157_p3 = scmp.lt.u32.totalorder %s153_s8, %s227_s2 }
  0x28   :  { %v55_v4 = vsub.f32 %v54_v3, %v51_v0  ;;  %v59_v5 = vsub.f32 %v54_v3, %v52_v1  ;;  %v64_v6 = vsub.f32 %v54_v3, %v53_v2 }
  0x29   :  { %p159_p4 = pnand %p157_p3, %p154_p2 }
  0x2a   :  { %v56_v7 = vmul.f32 -0.9, %v55_v4  ;;  %v57_v8 = vmul.f32 0.1, %v55_v4  ;;  %v60_v9 = vmul.f32 -0.5, %v59_v5  ;;  %v61_v10 = vmul.f32 0.5, %v59_v5 }
  0x2b   :  { %v65_v11 = vmul.f32 -0.1, %v64_v6  ;;  %v66_v12 = vmul.f32 0.9, %v64_v6 }
  0x2c   :  { %v58_v13 = vmax.f32 %v56_v7, %v57_v8  ;;  %v62_v14 = vmax.f32 %v60_v9, %v61_v10 }
  0x2d   :  { %v67_v15 = vmax.f32 %v65_v11, %v66_v12 }
  0x2e   :  { %v63_v16 = vadd.f32 %v62_v14, %v58_v13 }
  0x30   :  { %v68_v17 = vadd.f32 %v67_v15, %v63_v16 }
  0x32   :  { %76 = vadd.xlane.f32.xlu0 %v68_v17 }
  0xbf   :  { %v77_v18 = vpop.xlane.xlu0 %76 }
  0xc0   :  { %v78_v19 = vrot.slane %v77_v18, 4 }
  0xc2   :  { %v79_v20 = vadd.f32 %v78_v19, %v77_v18 }
  0xc4   :  { %v80_v21 = vrot.slane %v79_v20, 2 }
  0xc6   :  { %v81_v22 = vadd.f32 %v80_v21, %v79_v20 }
  0xc8   :  { %v82_v23 = vrot.slane %v81_v22, 1 }
  0xca   :  { %v83_v24 = vadd.f32 %v82_v23, %v81_v22 }
  0xcc   :  { %102 = vpush %v83_v24 }
  0xfd   :  { %s103_s1 = spop %102 }
  0xfe   :  { %86 = sst [smem:[#allocation8]] %s103_s1 }
  0xff   :  { %162 = shalt.err (!%p159_p4)
}
 0x100   :  { %s173_s13 = smov [#allocation8]  }
 0x101   :  { %94 = dma.smem_to_hbm %s173_s13, 16, %s227_s2, [#allocation5]  }
 0x102   :  { %167 = dma.done.wait [#allocation5], 16  }
 0x103   :  { %168 = vsyncadd [#allocation5], 4294967280 }
 0x104   :  { %98 = sfence }
 0x105   :  { %99 = vsyncpa [#allocation4], 1 }
 0x106   :  { %100 = vsyncpa [#allocation7], 1 }
 0x107   :  { %101 = vsyncpa [#allocation5], 1 }

</bundles_post_ra>
